<compile_context>
chip_gen: v7x
topology: tpu7x:2x2x1
jax: 0.10.0
libtpu: 0.0.40
codegen_flags: <defaults>
</compile_context>

<pallas_src>
import jax
import jax.numpy as jnp
from jax import lax
from jax.experimental import pallas as pl
from jax.experimental.pallas import tpu as pltpu


def _mf_kernel(uid_ref, iid_ref, ut_ref, vt_ref, o_ref):
    """One batch tile of TB ratings.

    uid_ref, iid_ref : (1, TB)       int32  user / item ids for this tile
    ut_ref           : (F, n_users)  f32    user-factor table, feature-major (VMEM resident)
    vt_ref           : (F, n_items)  f32    item-factor table, feature-major (VMEM resident)
    o_ref            : (1, TB)       f32    per-rating dot product (lane-dense)
    """
    uids = uid_ref[...]                       # (1, TB)
    iids = iid_ref[...]                       # (1, TB)
    n_users = ut_ref.shape[1]
    n_items = vt_ref.shape[1]
    tb = uids.shape[1]

    # One-hot selection matrices with the batch on the lane axis so every vreg
    # lane carries useful work even when n_factors < 128.
    u_sel = lax.broadcasted_iota(jnp.int32, (n_users, tb), 0) == uids   # (n_users, TB)
    i_sel = lax.broadcasted_iota(jnp.int32, (n_items, tb), 0) == iids   # (n_items, TB)
    u_onehot = jnp.where(u_sel, 1.0, 0.0).astype(ut_ref.dtype)
    i_onehot = jnp.where(i_sel, 1.0, 0.0).astype(vt_ref.dtype)

    # Embedding gather as an MXU matmul: (F, n_rows) @ (n_rows, TB) -> (F, TB).
    # HIGHEST precision keeps the gathered f32 values exact (no bf16 demotion).
    u_emb = jnp.dot(ut_ref[...], u_onehot,
                    precision=lax.Precision.HIGHEST,
                    preferred_element_type=jnp.float32)
    v_emb = jnp.dot(vt_ref[...], i_onehot,
                    precision=lax.Precision.HIGHEST,
                    preferred_element_type=jnp.float32)

    # Dot product over the factor (sublane) axis -> lane-dense (1, TB) row.
    o_ref[...] = jnp.sum(u_emb * v_emb, axis=0, keepdims=True).astype(o_ref.dtype)


def matrix_factorization_forward(user_factors, item_factors, user_ids, item_ids,
                                 *, tile_b=128):
    """out[b] = sum_f user_factors[user_ids[b], f] * item_factors[item_ids[b], f]

    user_factors: (n_users, F) f32, item_factors: (n_items, F) f32,
    user_ids/item_ids: (B,) int -> returns (B,) f32.
    """
    assert tile_b % 128 == 0, "tile_b must be a multiple of 128 (lane-dense output)"
    n_users, f = user_factors.shape
    n_items, f2 = item_factors.shape
    assert f == f2
    b = user_ids.shape[0]

    # Small-table fast path: both factor tables stay resident in VMEM.
    itemsize = jnp.dtype(user_factors.dtype).itemsize
    table_bytes = (user_factors.size + item_factors.size) * itemsize
    # TODO(synk): add a large-table path (tables via BlockSpec(memory_space=pl.ANY),
    # scalar-prefetched ids driving double-buffered pltpu.make_async_copy row gathers)
    # when the factor tables do not fit comfortably in VMEM.
    if table_bytes > 16 * 1024 * 1024:
        raise NotImplementedError("factor tables too large for the in-VMEM fast path")

    n_tiles = pl.cdiv(b, tile_b)
    bp = n_tiles * tile_b

    # Pad ids (with valid index 0) to whole lane-dense tiles; lay them out as a
    # (1, bp) row so every id/output block is a clean (1, tile_b) tile.
    uid = jnp.zeros((1, bp), jnp.int32).at[0, :b].set(user_ids.astype(jnp.int32))
    iid = jnp.zeros((1, bp), jnp.int32).at[0, :b].set(item_ids.astype(jnp.int32))

    # Feature-major tables keep the batch on the lane axis inside the kernel.
    ut = user_factors.T   # (F, n_users)
    vt = item_factors.T   # (F, n_items)

    out = pl.pallas_call(
        _mf_kernel,
        out_shape=jax.ShapeDtypeStruct((1, bp), jnp.float32),
        grid_spec=pltpu.PrefetchScalarGridSpec(
            num_scalar_prefetch=0,
            grid=(n_tiles,),
            in_specs=[
                pl.BlockSpec((1, tile_b), lambda g: (0, g)),        # user ids tile
                pl.BlockSpec((1, tile_b), lambda g: (0, g)),        # item ids tile
                pl.BlockSpec((f, n_users), lambda g: (0, 0)),       # full user table (resident)
                pl.BlockSpec((f, n_items), lambda g: (0, 0)),       # full item table (resident)
            ],
            out_specs=pl.BlockSpec((1, tile_b), lambda g: (0, g)),  # lane-dense output row
        ),
        compiler_params=pltpu.CompilerParams(
            dimension_semantics=("parallel",),   # batch tiles are independent (2 TCs on v7x)
        ),
    )(uid, iid, ut, vt)

    return out[0, :b]


if __name__ == "__main__":
    n_users, n_items, n_factors = 64, 48, 32
    batch = 200   # 2 grid tiles of 128 (exercises multi-tile + padding)

    key = jax.random.PRNGKey(0)
    k_u, k_i, k_uid, k_iid = jax.random.split(key, 4)

    # deterministic init matching nn.Embedding(...).weight.data.normal_(0, 0.1)
    user_factors = 0.1 * jax.random.normal(k_u, (n_users, n_factors), dtype=jnp.float32)
    item_factors = 0.1 * jax.random.normal(k_i, (n_items, n_factors), dtype=jnp.float32)

    user_ids = jax.random.randint(k_uid, (batch,), 0, n_users, dtype=jnp.int32)
    item_ids = jax.random.randint(k_iid, (batch,), 0, n_items, dtype=jnp.int32)

    out = matrix_factorization_forward(user_factors, item_factors, user_ids, item_ids)
    out = jax.block_until_ready(out)

    # reference check in plain JAX
    ref = jnp.sum(user_factors[user_ids] * item_factors[item_ids], axis=1)
    assert out.shape == (batch,)
    assert jnp.allclose(out, ref, atol=1e-5, rtol=1e-5), float(jnp.max(jnp.abs(out - ref)))

    print("KERNEL_OK")
</pallas_src>

<mosaic_0001>
module attributes {stable_mosaic.version = 11 : i64} {
  func.func @_mf_kernel(%arg0: i32, %arg1: memref<1x128xi32, #tpu.memory_space<vmem>>, %arg2: memref<1x128xi32, #tpu.memory_space<vmem>>, %arg3: memref<32x64xf32, #tpu.memory_space<vmem>>, %arg4: memref<32x48xf32, #tpu.memory_space<vmem>>, %arg5: memref<1x128xf32, #tpu.memory_space<vmem>>) attributes {dimension_semantics = [#tpu.dimension_semantics<parallel>], iteration_bounds = array<i64: 2>, scalar_prefetch = 0 : i64, scratch_operands = 0 : i64, tpu.core_type = #tpu.core_type<tc>, window_params = [{transform_indices = @transform_0, window_bounds = array<i64: 1, 128>}, {transform_indices = @transform_1, window_bounds = array<i64: 1, 128>}, {pipeline_mode = #tpu.pipeline_mode<synchronous>, transform_indices = @transform_2, window_bounds = array<i64: 32, 64>}, {pipeline_mode = #tpu.pipeline_mode<synchronous>, transform_indices = @transform_3, window_bounds = array<i64: 32, 48>}, {transform_indices = @transform_4, window_bounds = array<i64: 1, 128>}]} {
    %c0 = arith.constant 0 : index
    %c0_0 = arith.constant 0 : index
    %0 = vector.load %arg1[%c0, %c0_0] : memref<1x128xi32, #tpu.memory_space<vmem>>, vector<1x128xi32>
    %c0_1 = arith.constant 0 : index
    %c0_2 = arith.constant 0 : index
    %1 = vector.load %arg2[%c0_1, %c0_2] : memref<1x128xi32, #tpu.memory_space<vmem>>, vector<1x128xi32>
    %2 = tpu.iota {dimensions = array<i32: 0>} : vector<64x128xi32>
    %3 = vector.broadcast %0 : vector<1x128xi32> to vector<64x128xi32>
    %4 = arith.cmpi eq, %2, %3 : vector<64x128xi32>
    %5 = tpu.iota {dimensions = array<i32: 0>} : vector<48x128xi32>
    %6 = vector.broadcast %1 : vector<1x128xi32> to vector<48x128xi32>
    %7 = arith.cmpi eq, %5, %6 : vector<48x128xi32>
    %cst = arith.constant 1.000000e+00 : f32
    %cst_3 = arith.constant 0.000000e+00 : f32
    %8 = vector.broadcast %cst : f32 to vector<64x128xf32>
    %9 = vector.broadcast %cst_3 : f32 to vector<64x128xf32>
    %10 = arith.select %4, %8, %9 : vector<64x128xi1>, vector<64x128xf32>
    %cst_4 = arith.constant 1.000000e+00 : f32
    %cst_5 = arith.constant 0.000000e+00 : f32
    %11 = vector.broadcast %cst_4 : f32 to vector<48x128xf32>
    %12 = vector.broadcast %cst_5 : f32 to vector<48x128xf32>
    %13 = arith.select %7, %11, %12 : vector<48x128xi1>, vector<48x128xf32>
    %c0_6 = arith.constant 0 : index
    %c0_7 = arith.constant 0 : index
    %14 = vector.load %arg3[%c0_6, %c0_7] : memref<32x64xf32, #tpu.memory_space<vmem>>, vector<32x64xf32>
    %cst_8 = arith.constant dense<0.000000e+00> : vector<32x128xf32>
    %15 = tpu.matmul %14, %10, %cst_8 {dimension_numbers = #tpu.dot_dimension_numbers<[1], [0], [0], [1], [0, 0, 1, 1], [], []>, precision = #tpu.contract_precision<fp32>} : vector<32x64xf32>, vector<64x128xf32>, vector<32x128xf32> -> vector<32x128xf32>
    %c0_9 = arith.constant 0 : index
    %c0_10 = arith.constant 0 : index
    %16 = vector.load %arg4[%c0_9, %c0_10] : memref<32x48xf32, #tpu.memory_space<vmem>>, vector<32x48xf32>
    %cst_11 = arith.constant dense<0.000000e+00> : vector<32x128xf32>
    %17 = tpu.matmul %16, %13, %cst_11 {dimension_numbers = #tpu.dot_dimension_numbers<[1], [0], [0], [1], [0, 0, 1, 1], [], []>, precision = #tpu.contract_precision<fp32>} : vector<32x48xf32>, vector<48x128xf32>, vector<32x128xf32> -> vector<32x128xf32>
    %18 = arith.mulf %15, %17 : vector<32x128xf32>
    %cst_12 = arith.constant dense<0.000000e+00> : vector<128xf32>
    %19 = vector.multi_reduction <add>, %18, %cst_12 [0] : vector<32x128xf32> to vector<128xf32>
    %20 = vector.shape_cast %19 : vector<128xf32> to vector<1x128xf32>
    %c0_13 = arith.constant 0 : index
    %c0_14 = arith.constant 0 : index
    %21 = vector.load %arg5[%c0_13, %c0_14] : memref<1x128xf32, #tpu.memory_space<vmem>>, vector<1x128xf32>
    tpu.vector_store %arg5[%c0_13, %c0_14], %20 {strides = array<i32>} : memref<1x128xf32, #tpu.memory_space<vmem>>, vector<1x128xf32>,
    return
  }
  func.func @transform_0(%arg0: i32) -> (i32, i32) {
    %c0_i32 = arith.constant 0 : i32
    %c0_i32_0 = arith.constant 0 : i32
    return %c0_i32, %arg0 : i32, i32
  }
  func.func @transform_1(%arg0: i32) -> (i32, i32) {
    %c0_i32 = arith.constant 0 : i32
    %c0_i32_0 = arith.constant 0 : i32
    return %c0_i32, %arg0 : i32, i32
  }
  func.func @transform_2(%arg0: i32) -> (i32, i32) {
    %c0_i32 = arith.constant 0 : i32
    %c0_i32_0 = arith.constant 0 : i32
    %c0_i32_1 = arith.constant 0 : i32
    return %c0_i32, %c0_i32_0 : i32, i32
  }
  func.func @transform_3(%arg0: i32) -> (i32, i32) {
    %c0_i32 = arith.constant 0 : i32
    %c0_i32_0 = arith.constant 0 : i32
    %c0_i32_1 = arith.constant 0 : i32
    return %c0_i32, %c0_i32_0 : i32, i32
  }
  func.func @transform_4(%arg0: i32) -> (i32, i32) {
    %c0_i32 = arith.constant 0 : i32
    %c0_i32_0 = arith.constant 0 : i32
    return %c0_i32, %arg0 : i32, i32
  }
}

</mosaic_0001>

<bundles_post_ra>
// kernel: tpu_custom_call.1
= control target key start
LH: loop header
LB: loop body
LE: loop exit
PB: predicated region body
PF: predicated region fallthrough
CT: control target
= control target key end

     0   :  { %9 = vsyncpa [#allocation3], 0  ;;  %s3326_s0 = inlined_call_operand.hbm [shape: s32[1,256], index: 0, kind: input, shape index: {}]   ;;  %s3327_s1 = inlined_call_operand.vmem [shape: s32[1,256], index: 1, kind: input, shape index: {}]   ;;  %s3328_s2 = inlined_call_operand.hbm [shape: f32[32,64], index: 2, kind: input, shape index: {}]   ;;  %s3329_s3 = inlined_call_operand.hbm [shape: f32[32,48], index: 3, kind: input, shape index: {}]   ;;  %s3330_s4 = inlined_call_operand.hbm [shape: f32[1,256], index: 4, kind: output, shape index: {}]  }
   0x1   :  { %11 = vsyncpa [#allocation3 + $0x1], 0 }
   0x2   :  { %12 = vsyncpa [#allocation6], 0 }
   0x3   :  { %13 = vsyncpa [#allocation4], 0 }
   0x4   :  { %15 = vsyncpa [#allocation4 + $0x1], 0  ;;  %s2571_s15 = smov 0   ;;  %s2573_s16 = smov 0  }
   0x5   :  { %s2575_s17 = smov 0   ;;  %s2577_s18 = smov 0  }
   0x6 LB: > { %s2592_s19 = sadd.s32 4294967295, %s2536_s18   ;;  %s1673_s20 = sadd.s32 4294967294, %s2536_s18   ;;  %s2536_s18 = sphi %s2577_s18, %s3384_s18   ;;  %s2532_s17 = sphi %s2575_s17, %s3383_s17   ;;  %s2528_s16 = sphi %s2573_s16, %s3382_s16   ;;  %s2524_s15 = sphi %s2571_s15, %s3381_s15  }
   0x7   : > { %p41_p0 = scmp.ne.s32.totalorder %s2528_s16, %s2524_s15  ;;  %p3331_p1 = scmp.eq.s32.totalorder %s2592_s19, 0 }
   0x8   : > { %p139_p3 = scmp.eq.s32.totalorder %s1673_s20, 1  ;;  %p1674_p5 = scmp.ge.s32.totalorder %s2536_s18, 1 }
   0x9   : > { %p2601_p4 = por %p3331_p1, %p41_p0  ;;  %p146_p7 = scmp.lt.s32.totalorder %s2536_s18, 3 }
   0xa   : > { %p2606_p6 = por %p139_p3, %p41_p0  ;;  %s2538_s24 = smov [#allocation5]  }
   0xb   : > { %s3344_s21 = scalar_select %p2601_p4, 1, 0 }
   0xc   : > { %s3345_s22 = scalar_select %p2606_p6, 1, 0 }
   0xd   : > { %p2611_p8 = pnand %p1674_p5, %p146_p7  ;;  %s158_s25 = sshll.u32 %s2538_s24, 4  ;;  %s2615_s25 = int_to_ptr.vmem [resolvable:$true] %s158_s25 }
   0xe   : > { %s2539_s27 = smov [#allocation7]   ;;  %s2380_s5 = scalar_lea.hbm %s3328_s2, 512 }
   0xf   : > { %p2321_p9 = pneg %p2611_p8  ;;  %s171_s28 = sshll.u32 %s2539_s27, 4  ;;  %s2626_s28 = int_to_ptr.vmem [resolvable:$true] %s171_s28 }
  0x10   : > { %p2381_p12 = scmp.ne.s32.totalorder %s3328_s2, %s2380_s5  ;;  %p2387_p5 = scmp.lt.u32.totalorder %s2380_s5, %s3328_s2 }
  0x11   : > { %p2622_p11 = pnand %p2321_p9, %p3331_p1 }
  0x13   : > { %p2382_p13 = pneg %p2622_p11 }
  0x15   : > { %p2383_p0 = pnand %p2382_p13, %p2381_p12 }
  0x17   : > { %p2384_p3 = pneg %p2383_p0 }
  0x19   : > { %p2389_p7 = pnand %p2387_p5, %p2384_p3 }
  0x1b   : > { %2392 = shalt.err (!%p2389_p7)
}
  0x1c   : > { %s2393_s10 = scalar_lea.vmem %s2615_s25, 512  ;;  %p2401_p2 = scmp.lt.s32.totalorder %s2615_s25, %s2615_s25 }
  0x1d   : > { %p2394_p9 = scmp.ne.s32.totalorder %s2615_s25, %s2393_s10  ;;  %p2402_p12 = scmp.lt.s32.totalorder %s2393_s10, %s2393_s10 }
  0x1f   : > { %p2396_p10 = pnand %p2394_p9, %p2382_p13  ;;  %p2403_p0 = por %p2402_p12, %p2401_p2 }
  0x21   : > { %p2397_p1 = pneg %p2396_p10 }
  0x23   : > { %p2404_p6 = pnand %p2403_p0, %p2397_p1 }
  0x25   : > { %2407 = shalt.err (!%p2404_p6)
}
  0x26   : > { %s2540_s11 = smov 128   ;;  %s2541_s12 = smov 8  }
  0x27   : > { %2324 = dma.hbm_to_vmem [thread:$0]  (!%p2622_p11), %s3328_s2, 512, %s2615_s25, [#allocation6], %s2540_s11, %s2540_s11, %s2541_s12  }
  0x28   : > { %s2408_s27 = scalar_lea.hbm %s3329_s3, 512 }
  0x29   : > { %p2409_p2 = scmp.ne.s32.totalorder %s3329_s3, %s2408_s27  ;;  %p2415_p10 = scmp.lt.u32.totalorder %s2408_s27, %s3329_s3 }
  0x2b   : > { %p2411_p1 = pnand %p2409_p2, %p2382_p13 }
  0x2d   : > { %p2412_p6 = pneg %p2411_p1 }
  0x2f   : > { %p2417_p3 = pnand %p2415_p10, %p2412_p6 }
  0x31   : > { %2420 = shalt.err (!%p2417_p3)
}
  0x32   : > { %s2421_s25 = scalar_lea.vmem %s2626_s28, 512  ;;  %p2429_p12 = scmp.lt.s32.totalorder %s2626_s28, %s2626_s28 }
  0x33   : > { %p2422_p5 = scmp.ne.s32.totalorder %s2626_s28, %s2421_s25  ;;  %p2430_p0 = scmp.lt.s32.totalorder %s2421_s25, %s2421_s25 }
  0x35   : > { %p2424_p7 = pnand %p2422_p5, %p2382_p13  ;;  %p2431_p2 = por %p2430_p0, %p2429_p12 }
  0x37   : > { %p2425_p9 = pneg %p2424_p7 }
  0x39   : > { %p2432_p1 = pnand %p2431_p2, %p2425_p9 }
  0x3b   : > { %2435 = shalt.err (!%p2432_p1)
}
  0x3c   : > { %2327 = dma.hbm_to_vmem [thread:$0]  (!%p2622_p11), %s3329_s3, 512, %s2626_s28, [#allocation6], %s2540_s11, %s2540_s11, %s2541_s12  }
  0x3d   : > { %s2681_s9 = sadd.s32 1, %s2536_s18   ;;  %s28_s26 = sadd.s32 1, %s2532_s17 }
  0x3e   : > { %s25_s10 = ssub.s32 %s2536_s18, %s2681_s9  ;;  %p35_p13 = scmp.ne.s32.totalorder %s2532_s17, %s2528_s16 }
  0x3f   : > { %p26_p6 = scmp.eq.s32.totalorder %s25_s10, 0  ;;  %p36_p10 = scmp.eq.s32.totalorder %s2536_s18, 0 }
  0x40   : > { %p3348_p3 = scmp.eq.s32.totalorder %s2592_s19, 1  ;;  %p2338_p7 = scmp.lt.s32.totalorder %s2536_s18, 2 }
  0x41   : > { %s2697_s14 = scalar_select %p26_p6, %s2532_s17, %s28_s26  }
  0x42   : > { %p2691_p5 = por %p3348_p3, %p35_p13  ;;  %p37_p9 = por %p36_p10, %p35_p13 }
  0x43   : > { %s185_s20 = sand.u32 1, %s2532_s17   ;;  %s1678_s24 = sshll.u32 %s2536_s18, 4 }
  0x44   : > { %s3349_s13 = scalar_select %p2691_p5, 1, 0 }
  0x45   : > { %s188_s28 = scalar_lea.vmem [#allocation2], %s185_s20  ;;  %s2704_s29 = scalar_lea.hbm %s3326_s0, %s1678_s24 }
  0x46   : > { %s195_s11 = sshll.u32 %s188_s28, 4  ;;  %p2708_p11 = pnand %p2338_p7, %p37_p9  ;;  %s2706_s11 = int_to_ptr.vmem [resolvable:$true] %s195_s11 }
  0x47   : > { %s186_s5 = scalar_lea.sflag [#allocation3], %s185_s20  ;;  %s2436_s6 = scalar_lea.hbm %s2704_s29, 16 }
  0x48   : > { %p2437_p12 = scmp.ne.s32.totalorder %s2704_s29, %s2436_s6  ;;  %p2438_p0 = pneg %p2708_p11 }
  0x49   : > { %s2441_s8 = scalar_lea.hbm %s3326_s0, 32  ;;  %p2442_p13 = scmp.lt.u32.totalorder %s2704_s29, %s3326_s0 }
  0x4a   : > { %p2439_p2 = pnand %p2438_p0, %p2437_p12  ;;  %p2443_p6 = scmp.lt.u32.totalorder %s2441_s8, %s2436_s6 }
  0x4b   : > { %p2445_p3 = scmp.lt.u32.totalorder %s2436_s6, %s2704_s29 }
  0x4c   : > { %p2440_p1 = pneg %p2439_p2  ;;  %p2444_p10 = por %p2443_p6, %p2442_p13 }
  0x4e   : > { %p2446_p7 = por %p2445_p3, %p2444_p10 }
  0x50   : > { %p2447_p9 = pnand %p2446_p7, %p2440_p1 }
  0x52   : > { %2450 = shalt.err (!%p2447_p9)
}
  0x53   : > { %s2451_s20 = scalar_lea.vmem %s2706_s11, 16  ;;  %s2542_s24 = smov [#allocation2]  }
  0x54   : > { %p2452_p12 = scmp.ne.s32.totalorder %s2706_s11, %s2451_s20  ;;  %s2456_s28 = sshll.u32 %s2542_s24, 4  ;;  %s2457_s28 = int_to_ptr.vmem [resolvable:$false] %s2456_s28 }
  0x55   : > { %s2458_s12 = scalar_lea.vmem %s2457_s28, 32  ;;  %p2459_p4 = scmp.lt.s32.totalorder %s2706_s11, %s2457_s28 }
  0x56   : > { %p2454_p2 = pnand %p2452_p12, %p2438_p0  ;;  %p2460_p13 = scmp.lt.s32.totalorder %s2458_s12, %s2451_s20 }
  0x58   : > { %p2455_p5 = pneg %p2454_p2  ;;  %p2461_p6 = por %p2460_p13, %p2459_p4 }
  0x5a   : > { %p2462_p10 = pnand %p2461_p6, %p2455_p5 }
  0x5c   : > { %2465 = shalt.err (!%p2462_p10)
}
  0x5d   : > { %2331 = dma.hbm_to_vmem [thread:$0]  (!%p2708_p11), %s2704_s29, 16, %s2706_s11, %s186_s5  }
  0x5e   : > { %210 = sbr.rel (%p2611_p8) target bundleno = 456 (0x1c8), region = 36  ;;  %s2740_s27 = sand.u32 (!%p2611_p8), 1, %s2528_s16  }
  0x5f   : > { %s213_s6 = scalar_lea.sflag (!%p2611_p8), [#allocation3], %s2740_s27  ;;  %s215_s25 = scalar_lea.vmem (!%p2611_p8), [#allocation2], %s2740_s27 }
  0x60   : > { %p3351_p0 = scmp.ne.s32.totalorder (!%p2611_p8), %s3344_s21, 0 }
  0x65   : > { %2511 = dma.done.wait (%p3351_p0), %s213_s6, 16  }
  0x66   : > { %2513 = vsyncadd (%p3351_p0), %s213_s6, 4294967280  ;;  %p3352_p4 = scmp.eq.s32.totalorder %s2592_s19, 0 }
  0x68   : > { %2515 = dma.done.wait (%p3352_p4), [#allocation6], 1024   ;;  %p3353_p5 = pmov %p3352_p4 }
  0x69   : > { %v254_v0 = vlaneseq  ;;  %p249_p8 = scmp.lt.s32.totalorder %s2592_s19, 1  ;;  %v1682_v7 = vld [vmem:[%s215_s25] ss:$0 sm:$0xff]  ;;  %v2543_v11 = vmov 0.0   ;;  %v2544_v14 = vmov 1.0|1.0  }
  0x6a   : > { %2517 = vsyncadd (%p3353_p5), [#allocation6], 4294966272  ;;  %vm303_vm8 = vcmask 523264   ;;  %v299_v25 = vld [vmem:[#allocation5] sm:$0xff]  ;;  %v300_v43 = vld [vmem:[#allocation5 + $0x8] sm:$0xff]  ;;  %vm938_vm15 = vcmask 392192  }
  0x6b   : > { %v2752_v1 = vshrl.u32 %v254_v0, 7  ;;  %s2771_s21 = scalar_select %p249_p8, %s2592_s19, 1  ;;  %v305_v39 = vsel %vm303_vm8, %v299_v25, 0  ;;  %v308_v54 = vsel %vm303_vm8, %v300_v43, 0  ;;  %v302_v25 = vld [vmem:[#allocation5 + $0x18] sm:$0xff] }
  0x6c   : > { %v2873_v42 = vand.u32 4294901760, %v305_v39  ;;  %v2908_v58 = vand.u32 4294901760, %v308_v54  ;;  %s1726_s30 = sshll.u32 %s2592_s19, 4  ;;  %s248_s5 = scalar_lea.vmem [#allocation8], %s2740_s27 }
  0x6d   : > { %v2756_v2 = vadd.s32 8, %v2752_v1  ;;  %v2759_v3 = vadd.s32 16, %v2752_v1  ;;  %v2762_v4 = vadd.s32 24, %v2752_v1  ;;  %v2765_v5 = vadd.s32 32, %v2752_v1  ;;  %s251_s29 = scalar_lea.vmem %s3327_s1, %s2771_s21  ;;  %s1582_s7 = sshll.u32 %s248_s5, 4  ;;  %s3284_s7 = int_to_ptr.vmem [resolvable:$true] %s1582_s7 }
  0x6e   : > { %v2768_v6 = vadd.s32 40, %v2752_v1  ;;  %v261_v8 = vadd.s32 48, %v2752_v1  ;;  %v262_v9 = vadd.s32 56, %v2752_v1  ;;  %vm267_vm0 = vcmp.eq.s32.totalorder %v2752_v1, %v1682_v7  ;;  %v2844_v31 = vld [vmem:[%s251_s29] ss:$0 sm:$0xff]  ;;  %1899 = vmatprep.mubr.f32.mxu0 %v2873_v42  ;;  %s3282_s10 = scalar_lea.hbm %s3330_s4, %s1726_s30  ;;  %s1570_s20 = scalar_lea.sflag [#allocation4], %s2740_s27 }
  0x6f   : > { %vm268_vm1 = vcmp.eq.s32.totalorder %v2756_v2, %v1682_v7  ;;  %vm269_vm2 = vcmp.eq.s32.totalorder %v2759_v3, %v1682_v7  ;;  %vm270_vm3 = vcmp.eq.s32.totalorder %v2762_v4, %v1682_v7  ;;  %vm271_vm5 = vcmp.eq.s32.totalorder %v2765_v5, %v1682_v7  ;;  %s2466_s24 = scalar_lea.vmem %s3284_s7, 16  ;;  %p3378_p1 = scmp.ne.s32.totalorder %s3349_s13, 0 }
  0x70   : > { %vm2783_vm4 = vmpackc.low %vm268_vm1, %vm267_vm0  ;;  %v287_v12 = vsel %vm269_vm2, 1.0, %v2543_v11  ;;  %v288_v13 = vsel %vm270_vm3, 1.0, %v2543_v11  ;;  %vm272_vm6 = vcmp.eq.s32.totalorder %v2768_v6, %v1682_v7  ;;  %v289_v18 = vsel %vm271_vm5, 1.0, %v2543_v11  ;;  %p2467_p11 = scmp.ne.s32.totalorder %s3284_s7, %s2466_s24  ;;  %s2545_s19 = smov [#allocation8]  }
  0x71   : > { %2102 = vmatprep.subr.msk.bf16.mxu1 %vm2783_vm4, %v2544_v14  ;;  %vm2794_vm7 = vmpackc.low %vm270_vm3, %vm269_vm2  ;;  %v2798_v16 = vsub.f32 %v287_v12, %v287_v12  ;;  %v2800_v17 = vsub.f32 %v288_v13, %v288_v13  ;;  %v290_v19 = vsel %vm272_vm6, 1.0, %v2543_v11  ;;  %v2815_v20 = vsub.f32 %v289_v18, %v289_v18  ;;  %s2470_s28 = sshll.u32 %s2545_s19, 4  ;;  %s2471_s28 = int_to_ptr.vmem [resolvable:$false] %s2470_s28 }
  0x72   : > { %2104 = vmatpush3.bf16.msk.msra.mxu1 %vm2783_vm4, %v2544_v14  ;;  %v285_v21 = vsel %vm267_vm0, 1.0, %v2543_v11  ;;  %v286_v22 = vsel %vm268_vm1, 1.0, %v2543_v11  ;;  %vm273_vm9 = vcmp.eq.s32.totalorder %v261_v8, %v1682_v7  ;;  %vm274_vm10 = vcmp.eq.s32.totalorder %v262_v9, %v1682_v7  ;;  %vm2834_vm11 = vmpackc.low %vm272_vm6, %vm271_vm5  ;;  %v301_v7 = vld [vmem:[#allocation5 + $0x10] sm:$0xff]  ;;  %p2468_p3 = pnand %p2467_p11, %p3378_p1  ;;  %s2472_s12 = scalar_lea.vmem %s2471_s28, 32 }
  0x73   : > { %2106 = vmatprep.subr.msk.bf16.mxu1 %vm2794_vm7, %v2544_v14  ;;  %v2826_v23 = vsub.f32 %v285_v21, %v285_v21  ;;  %v2828_v24 = vsub.f32 %v286_v22, %v286_v22  ;;  %v291_v27 = vsel %vm273_vm9, 1.0, %v2543_v11  ;;  %v292_v28 = vsel %vm274_vm10, 1.0, %v2543_v11  ;;  %vm2879_vm13 = vmpackc.low %vm274_vm10, %vm273_vm9  ;;  %p2473_p9 = scmp.lt.s32.totalorder %s3284_s7, %s2471_s28  ;;  %p2474_p12 = scmp.lt.s32.totalorder %s2472_s12, %s2466_s24 }
  0x74   : > { %v435_v29 = vand.u32 4294901760, %v2798_v16  ;;  %v441_v30 = vand.u32 4294901760, %v2800_v17  ;;  %v2846_v32 = vsub.f32 %v290_v19, %v290_v19  ;;  %v2850_v35 = vsub.f32 %v291_v27, %v291_v27  ;;  %p2469_p7 = pneg %p2468_p3 }
  0x75   : > { %v423_v33 = vand.u32 4294901760, %v2826_v23  ;;  %v429_v34 = vand.u32 4294901760, %v2828_v24  ;;  %v2855_v36 = vsub.f32 %v292_v28, %v292_v28  ;;  %vm279_vm12 = vcmp.eq.s32.totalorder %v2752_v1, %v2844_v31  ;;  %p2475_p2 = por %p2474_p12, %p2473_p9 }
  0x76   : > { %2108 = vmatpush3.bf16.msk.msra.mxu1 %vm2794_vm7, %v2544_v14  ;;  %v436_v37 = vsub.f32 %v2798_v16, %v435_v29  ;;  %v442_v38 = vsub.f32 %v2800_v17, %v441_v30  ;;  %vm280_vm14 = vcmp.eq.s32.totalorder %v2756_v2, %v2844_v31  ;;  %v293_v47 = vsel %vm279_vm12, 1.0, %v2543_v11 }
  0x77   : > { %2110 = vmatprep.subr.msk.bf16.mxu1 %vm2834_vm11, %v2544_v14  ;;  %v424_v40 = vsub.f32 %v2826_v23, %v423_v33  ;;  %v430_v41 = vsub.f32 %v2828_v24, %v429_v34  ;;  %v2890_v50 = vsub.f32 %v305_v39, %v2873_v42  ;;  %v294_v51 = vsel %vm280_vm14, 1.0, %v2543_v11  ;;  %vm2917_vm0 = vmpackc.low %vm280_vm14, %vm279_vm12  ;;  %p2476_p13 = pnand %p2475_p2, %p2469_p7 }
  0x78   : > { %v437_v45 = vand.u32 4294901760, %v436_v37  ;;  %v443_v46 = vand.u32 4294901760, %v442_v38  ;;  %v2900_v53 = vsub.f32 %v293_v47, %v293_v47  ;;  %v447_v55 = vand.u32 4294901760, %v2815_v20 }
  0x79   : > { %v425_v48 = vand.u32 4294901760, %v424_v40  ;;  %v431_v49 = vand.u32 4294901760, %v430_v41  ;;  %v383_v57 = vand.u32 4294901760, %v2890_v50  ;;  %v453_v59 = vand.u32 4294901760, %v2846_v32  ;;  %v934_v41 = vld [vmem:[#allocation7] sm:$0xff] }
  0x7a   : > { %2112 = vmatpush3.bf16.msk.msra.mxu1 %vm2834_vm11, %v2544_v14  ;;  %v2121_v52 = vpack.c.bf16 %v443_v46, %v437_v45  ;;  %v448_v61 = vsub.f32 %v2815_v20, %v447_v55  ;;  %vm281_vm1 = vcmp.eq.s32.totalorder %v2759_v3, %v2844_v31  ;;  %vm282_vm2 = vcmp.eq.s32.totalorder %v2762_v4, %v2844_v31 }
  0x7b   : > { %v2117_v56 = vpack.c.bf16 %v431_v49, %v425_v48  ;;  %2114 = vmatprep.subr.msk.bf16.mxu1 %vm2879_vm13, %v2544_v14  ;;  %v3337_v62 = vand.u32 4294901760, %v2850_v35  ;;  %v384_v63 = vsub.f32 %v2890_v50, %v383_v57  ;;  %v2933_v0 = vsub.f32 %v308_v54, %v2908_v58  ;;  %v935_v54 = vld [vmem:[#allocation7 + $0x8] sm:$0xff]  ;;  %vm2996_vm6 = vmpackc.low %vm282_vm2, %vm281_vm1 }
  0x7c   : > { %v454_v1 = vsub.f32 %v2846_v32, %v453_v59  ;;  %v295_v2 = vsel %vm281_vm1, 1.0, %v2543_v11  ;;  %v2945_v8 = vsub.f32 %v294_v51, %v294_v51  ;;  %v449_v9 = vand.u32 4294901760, %v448_v61 }
  0x7d   : > { %2118 = vmatprep.subr.bf16.mxu0 %v2117_v56  ;;  %v296_v12 = vsel %vm282_vm2, 1.0, %v2543_v11  ;;  %v460_v13 = vsub.f32 %v2850_v35, %v3337_v62  ;;  %v385_v18 = vand.u32 4294901760, %v384_v63  ;;  %v393_v19 = vand.u32 4294901760, %v2933_v0 }
  0x7e   : > { %2120 = vmatpush3.bf16.msra.mxu0 %v2117_v56  ;;  %2116 = vmatpush3.bf16.msk.msra.mxu1 %vm2879_vm13, %v2544_v14  ;;  %v455_v21 = vand.u32 4294901760, %v454_v1  ;;  %v2958_v22 = vsub.f32 %v295_v2, %v295_v2  ;;  %v3336_v28 = vand.u32 4294901760, %v2855_v36  ;;  %v311_v37 = vsel %vm303_vm8, %v301_v7, 0 }
  0x7f   : > { %2122 = vmatprep.subr.bf16.mxu0 %v2121_v52  ;;  %2198 = vmatprep.subr.msk.bf16.mxu1 %vm2917_vm0, %v2544_v14  ;;  %v461_v27 = vand.u32 4294901760, %v460_v13  ;;  %vm283_vm3 = vcmp.eq.s32.totalorder %v2765_v5, %v2844_v31  ;;  %v394_v38 = vsub.f32 %v2933_v0, %v393_v19  ;;  %v2967_v40 = vand.u32 4294901760, %v311_v37 }
  0x80   : > { %1877 = vmatprep.mubr.f32.mxu1 %v385_v18  ;;  %v2125_v39 = vpack.c.bf16 %v455_v21, %v449_v9  ;;  %vm284_vm5 = vcmp.eq.s32.totalorder %v2768_v6, %v2844_v31  ;;  %v466_v43 = vsub.f32 %v2855_v36, %v3336_v28  ;;  %v297_v45 = vsel %vm283_vm3, 1.0, %v2543_v11 }
  0x81   : > { %v298_v46 = vsel %vm284_vm5, 1.0, %v2543_v11  ;;  %v314_v47 = vsel %vm303_vm8, %v302_v25, 0  ;;  %v395_v48 = vand.u32 4294901760, %v394_v38  ;;  %v2983_v49 = vsub.f32 %v296_v12, %v296_v12  ;;  %v936_v38 = vld [vmem:[#allocation7 + $0x10] sm:$0xff]  ;;  %vm3040_vm8 = vmpackc.low %vm284_vm5, %vm283_vm3 }
  0x82   : > { %2124 = vmatpush3.bf16.msra.mxu0 %v2121_v52  ;;  %v2986_v51 = vsub.f32 %v311_v37, %v2967_v40  ;;  %v2988_v52 = vsub.f32 %v297_v45, %v297_v45  ;;  %v467_v56 = vand.u32 4294901760, %v466_v43  ;;  %v3000_v61 = vsub.f32 %v298_v46, %v298_v46 }
  0x83   : > { %2126 = vmatprep.subr.bf16.mxu0 %v2125_v39  ;;  %v3002_v63 = vand.u32 4294901760, %v314_v47  ;;  %v940_v1 = vsel %vm938_vm15, %v934_v41, 0  ;;  %1878 = vmatmul.mubr.f32.vlgmr.msra.gmra.mrb[0].mxu1 %v395_v48  ;;  %v1058_v3 = vand.u32 4294901760, %v2900_v53  ;;  %v3339_v4 = vand.u32 4294901760, %v2945_v8 }
  0x84   : > { %v3338_v2 = vand.u32 4294901760, %v2986_v51  ;;  %v3006_v7 = vand.u32 4294901760, %v940_v1  ;;  %2200 = vmatpush3.bf16.msk.msra.mxu1 %vm2917_vm0, %v2544_v14  ;;  %v2129_v9 = vpack.c.bf16 %v467_v56, %v461_v27  ;;  %v2133_v13 = vpack.c.bf16 %v2828_v24, %v2826_v23 }
  0x85   : > { %v3014_v12 = vsub.f32 %v314_v47, %v3002_v63  ;;  %v943_v18 = vsel %vm938_vm15, %v935_v54, 0  ;;  %2202 = vmatprep.subr.msk.bf16.mxu1 %vm2996_vm6, %v2544_v14  ;;  %v1059_v27 = vsub.f32 %v2900_v53, %v1058_v3  ;;  %v1065_v37 = vsub.f32 %v2945_v8, %v3339_v4 }
  0x86   : > { %2128 = vmatpush3.bf16.msra.mxu0 %v2125_v39  ;;  %v404_v21 = vsub.f32 %v2986_v51, %v3338_v2  ;;  %v3026_v25 = vsub.f32 %v940_v1, %v3006_v7  ;;  %v3045_v43 = vand.u32 4294901760, %v943_v18  ;;  %v3335_v45 = vand.u32 4294901760, %v2958_v22 }
  0x87   : > { %2130 = vmatprep.subr.bf16.mxu0 %v2129_v9  ;;  %v3334_v41 = vand.u32 4294901760, %v3014_v12  ;;  %v3341_v46 = vand.u32 4294901760, %v2983_v49  ;;  %v1060_v54 = vand.u32 4294901760, %v1059_v27  ;;  %v1066_v5 = vand.u32 4294901760, %v1065_v37  ;;  %v937_v37 = vld [vmem:[#allocation7 + $0x18] sm:$0xff] }
  0x88   : > { %v405_v47 = vand.u32 4294901760, %v404_v21  ;;  %v1018_v48 = vand.u32 4294901760, %v3026_v25  ;;  %2204 = vmatpush3.bf16.msk.msra.mxu1 %vm2996_vm6, %v2544_v14  ;;  %v3057_v31 = vsub.f32 %v943_v18, %v3045_v43  ;;  %v1071_v56 = vsub.f32 %v2958_v22, %v3335_v45 }
  0x89   : > { %v414_v6 = vsub.f32 %v3014_v12, %v3334_v41  ;;  %v946_v1 = vsel %vm938_vm15, %v936_v38, 0  ;;  %2206 = vmatprep.subr.msk.bf16.mxu1 %vm3040_vm8, %v2544_v14  ;;  %v2137_v21 = vpack.c.bf16 %v2800_v17, %v2798_v16  ;;  %v1077_v18 = vsub.f32 %v2983_v49, %v3341_v46 }
  0x8a   : > { %2132 = vmatpush3.bf16.msra.mxu0 %v2129_v9  ;;  %1880 = vmatprep.mubr.f32.mxu1 %v405_v47  ;;  %v1019_v9 = vsub.f32 %v3026_v25, %v1018_v48  ;;  %v3074_v27 = vand.u32 4294901760, %v946_v1  ;;  %v2209_v47 = vpack.c.bf16 %v1066_v5, %v1060_v54  ;;  %v3340_v41 = vand.u32 4294901760, %v3057_v31 }
  0x8b   : > { %v415_v38 = vand.u32 4294901760, %v414_v6  ;;  %2134 = vmatprep.subr.bf16.mxu0 %v2133_v13  ;;  %v1072_v45 = vand.u32 4294901760, %v1071_v56  ;;  %v1078_v62 = vand.u32 4294901760, %v1077_v18  ;;  %v3342_v4 = vand.u32 4294901760, %v2988_v52 }
  0x8c   : > { %v1020_v28 = vand.u32 4294901760, %v1019_v9  ;;  %v3079_v2 = vsub.f32 %v946_v1, %v3074_v27  ;;  %v1029_v6 = vsub.f32 %v3057_v31, %v3340_v41  ;;  %v3343_v54 = vand.u32 4294901760, %v3000_v61  ;;  %2208 = vmatpush3.bf16.msk.msra.mxu1 %vm3040_vm8, %v2544_v14 }
  0x8d   : > { %1900 = vmatmul.mubr.f32.vlgmr.msra.gmra.mrb[0].mxu0 %v2908_v58  ;;  %1881 = vmatmul.mubr.f32.gmra.mrb[2].mxu1 %v415_v38  ;;  %v949_v5 = vsel %vm938_vm15, %v937_v37, 0  ;;  %v2141_v56 = vpack.c.bf16 %v2846_v32, %v2815_v20  ;;  %v2213_v37 = vpack.c.bf16 %v1078_v62, %v1072_v45  ;;  %v2169_v23 = vpack.c.bf16 %v441_v30, %v435_v29 }
  0x8e   : > { %2136 = vmatpush3.bf16.msra.mxu0 %v2133_v13  ;;  %2005 = vmatprep.mubr.f32.mxu1 %v1020_v28  ;;  %v1038_v1 = vand.u32 4294901760, %v3079_v2  ;;  %v1083_v13 = vsub.f32 %v2988_v52, %v3342_v4  ;;  %v3096_v9 = vand.u32 4294901760, %v949_v5  ;;  %v1030_v18 = vand.u32 4294901760, %v1029_v6 }
  0x8f   : > { %2210 = vmatprep.subr.bf16.mxu1 %v2209_v47  ;;  %2138 = vmatprep.subr.bf16.mxu0 %v2137_v21  ;;  %v1089_v38 = vsub.f32 %v3000_v61, %v3343_v54  ;;  %v2145_v6 = vpack.c.bf16 %v2855_v36, %v2850_v35  ;;  %v2173_v16 = vpack.c.bf16 %v453_v59, %v447_v55  ;;  %v3368_v17 = vand.u32 4294901760, %v2945_v8 }
  0x90   : > { %v1039_v28 = vsub.f32 %v3079_v2, %v1038_v1  ;;  %v1084_v41 = vand.u32 4294901760, %v1083_v13  ;;  %v3105_v46 = vsub.f32 %v949_v5, %v3096_v9  ;;  %1902 = vmatprep.mubr.f32.mxu0 %v2967_v40  ;;  %v3369_v29 = vand.u32 4294901760, %v2986_v51 }
  0x91   : > { %2006 = vmatmul.mubr.f32.vlgmr.msra.gmra.mrb[4].mxu1 %v1030_v18  ;;  %v1090_v4 = vand.u32 4294901760, %v1089_v38  ;;  %1903 = vmatmul.mubr.f32.gmra.mrb[2].mxu0 %v3002_v63  ;;  %v2245_v24 = vpack.c.bf16 %v3368_v17, %v1058_v3  ;;  %v3370_v20 = vand.u32 4294901760, %v2850_v35  ;;  %v3371_v30 = vand.u32 4294901760, %v2855_v36 }
  0x92   : > { %2140 = vmatpush3.bf16.msra.mxu0 %v2137_v21  ;;  %2212 = vmatpush3.bf16.msra.mxu1 %v2209_v47  ;;  %v1040_v62 = vand.u32 4294901760, %v1039_v28  ;;  %v1048_v45 = vand.u32 4294901760, %v3105_v46  ;;  %v2221_v47 = vpack.c.bf16 %v2945_v8, %v2900_v53  ;;  %v3374_v53 = vand.u32 4294901760, %v3014_v12 }
  0x93   : > { %2142 = vmatprep.subr.bf16.mxu0 %v2141_v56  ;;  %2214 = vmatprep.subr.bf16.mxu1 %v2213_v37  ;;  %v2217_v54 = vpack.c.bf16 %v1090_v4, %v1084_v41  ;;  %v2225_v4 = vpack.c.bf16 %v2983_v49, %v2958_v22  ;;  %v2229_v41 = vpack.c.bf16 %v3000_v61, %v2988_v52  ;;  %v3375_v55 = vand.u32 4294901760, %v3057_v31 }
  0x94   : > { %2008 = vmatprep.mubr.f32.mxu1 %v1040_v62  ;;  %v1049_v5 = vsub.f32 %v3105_v46, %v1048_v45  ;;  %1921 = vmatprep.mubr.f32.mxu0 %v2890_v50  ;;  %v2177_v32 = vpack.c.bf16 %v3371_v30, %v3370_v20  ;;  %v3376_v35 = vand.u32 4294901760, %v2988_v52  ;;  %v3377_v36 = vand.u32 4294901760, %v3000_v61 }
  0x96   : > { %2144 = vmatpush3.bf16.msra.mxu0 %v2141_v56  ;;  %2216 = vmatpush3.bf16.msra.mxu1 %v2213_v37  ;;  %v1050_v21 = vand.u32 4294901760, %v1049_v5 }
  0x97   : > { %2146 = vmatprep.subr.bf16.mxu0 %v2145_v6  ;;  %2218 = vmatprep.subr.bf16.mxu1 %v2217_v54 }
  0x98   : > { %2009 = vmatmul.mubr.f32.gmra.mrb[6].mxu1 %v1050_v21 }
  0x99   : > { %2023 = vmatprep.mubr.f32.mxu1 %v3006_v7 }
  0x9a   : > { %2148 = vmatpush3.bf16.msra.mxu0 %v2145_v6  ;;  %2220 = vmatpush3.bf16.msra.mxu1 %v2217_v54  ;;  %v2165_v54 = vpack.c.bf16 %v429_v34, %v423_v33  ;;  %v3372_v33 = vand.u32 4294901760, %v2958_v22  ;;  %v3373_v34 = vand.u32 4294901760, %v2983_v49 }
  0x9b   : > { %2150 = vmatprep.subr.msk.bf16.mxu0 %vm2783_vm4, %v2544_v14  ;;  %2222 = vmatprep.subr.bf16.mxu1 %v2221_v47 }
  0x9c   : > { %v2249_v50 = vpack.c.bf16 %v3373_v34, %v3372_v33 }
  0x9d   : > { %1922 = vmatmul.mubr.f32.vlgmr.msra.gmra.mrb[0].mxu0 %v2933_v0  ;;  %2024 = vmatmul.mubr.f32.vlgmr.msra.gmra.mrb[4].mxu1 %v3045_v43 }
  0x9e   : > { %2152 = vmatpush3.bf16.msk.msra.mxu0 %vm2783_vm4, %v2544_v14  ;;  %2224 = vmatpush3.bf16.msra.mxu1 %v2221_v47 }
  0x9f   : > { %2154 = vmatprep.subr.msk.bf16.mxu0 %vm2794_vm7, %v2544_v14  ;;  %2226 = vmatprep.subr.bf16.mxu1 %v2225_v4 }
  0xa0   : > { %2026 = vmatprep.mubr.f32.mxu1 %v3074_v27  ;;  %1924 = vmatprep.mubr.f32.mxu0 %v2986_v51 }
  0xa1   : > { %2027 = vmatmul.mubr.f32.gmra.mrb[6].mxu1 %v3096_v9  ;;  %1925 = vmatmul.mubr.f32.gmra.mrb[2].mxu0 %v3014_v12 }
  0xa2   : > { %2156 = vmatpush3.bf16.msk.msra.mxu0 %vm2794_vm7, %v2544_v14  ;;  %2228 = vmatpush3.bf16.msra.mxu1 %v2225_v4 }
  0xa3   : > { %2158 = vmatprep.subr.msk.bf16.mxu0 %vm2834_vm11, %v2544_v14  ;;  %2230 = vmatprep.subr.bf16.mxu1 %v2229_v41 }
  0xa4   : > { %2041 = vmatprep.mubr.f32.mxu1 %v3026_v25  ;;  %1943 = vmatprep.mubr.f32.mxu0 %v383_v57  ;;  %v2253_v57 = vpack.c.bf16 %v3377_v36, %v3376_v35 }
  0xa6   : > { %2160 = vmatpush3.bf16.msk.msra.mxu0 %vm2834_vm11, %v2544_v14  ;;  %2232 = vmatpush3.bf16.msra.mxu1 %v2229_v41 }
  0xa7   : > { %2162 = vmatprep.subr.msk.bf16.mxu0 %vm2879_vm13, %v2544_v14  ;;  %2234 = vmatprep.subr.msk.bf16.mxu1 %vm2917_vm0, %v2544_v14 }
  0xa9   : > { %2042 = vmatmul.mubr.f32.vlgmr.msra.gmra.mrb[4].mxu1 %v3057_v31 }
  0xaa   : > { %2164 = vmatpush3.bf16.msk.msra.mxu0 %vm2879_vm13, %v2544_v14  ;;  %2236 = vmatpush3.bf16.msk.msra.mxu1 %vm2917_vm0, %v2544_v14 }
  0xab   : > { %2166 = vmatprep.subr.bf16.mxu0 %v2165_v54  ;;  %2238 = vmatprep.subr.msk.bf16.mxu1 %vm2996_vm6, %v2544_v14 }
  0xac   : > { %2044 = vmatprep.mubr.f32.mxu1 %v3079_v2 }
  0xad   : > { %1944 = vmatmul.mubr.f32.vlgmr.msra.gmra.mrb[0].mxu0 %v393_v19  ;;  %2045 = vmatmul.mubr.f32.gmra.mrb[6].mxu1 %v3105_v46 }
  0xae   : > { %2168 = vmatpush3.bf16.msra.mxu0 %v2165_v54  ;;  %2240 = vmatpush3.bf16.msk.msra.mxu1 %vm2996_vm6, %v2544_v14 }
  0xaf   : > { %2170 = vmatprep.subr.bf16.mxu0 %v2169_v23  ;;  %2242 = vmatprep.subr.msk.bf16.mxu1 %vm3040_vm8, %v2544_v14 }
  0xb0   : > { %2059 = vmatprep.mubr.f32.mxu1 %v1018_v48  ;;  %1946 = vmatprep.mubr.f32.mxu0 %v3369_v29 }
  0xb1   : > { %1947 = vmatmul.mubr.f32.gmra.mrb[2].mxu0 %v3374_v53 }
  0xb2   : > { %2172 = vmatpush3.bf16.msra.mxu0 %v2169_v23  ;;  %2244 = vmatpush3.bf16.msk.msra.mxu1 %vm3040_vm8, %v2544_v14 }
  0xb3   : > { %2174 = vmatprep.subr.bf16.mxu0 %v2173_v16  ;;  %2246 = vmatprep.subr.bf16.mxu1 %v2245_v24 }
  0xb4   : > { %1965 = vmatprep.mubr.f32.mxu0 %v2873_v42 }
  0xb5   : > { %2060 = vmatmul.mubr.f32.vlgmr.msra.gmra.mrb[4].mxu1 %v3375_v55 }
  0xb6   : > { %2176 = vmatpush3.bf16.msra.mxu0 %v2173_v16  ;;  %2248 = vmatpush3.bf16.msra.mxu1 %v2245_v24 }
  0xb7   : > { %2178 = vmatprep.subr.bf16.mxu0 %v2177_v32  ;;  %2250 = vmatprep.subr.bf16.mxu1 %v2249_v50 }
  0xb8   : > { %2062 = vmatprep.mubr.f32.mxu1 %v1038_v1 }
  0xb9   : > { %2063 = vmatmul.mubr.f32.gmra.mrb[6].mxu1 %v1048_v45 }
  0xba   : > { %2180 = vmatpush3.bf16.msra.mxu0 %v2177_v32  ;;  %2252 = vmatpush3.bf16.msra.mxu1 %v2249_v50 }
  0xbb   : > { %2182 = vmatprep.subr.msk.bf16.mxu0 %vm2783_vm4, %v2544_v14  ;;  %2254 = vmatprep.subr.bf16.mxu1 %v2253_v57 }
  0xbc   : > { %2077 = vmatprep.mubr.f32.mxu1 %v3006_v7 }
  0xbd   : > { %1966 = vmatmul.mubr.f32.vlgmr.msra.gmra.mrb[0].mxu0 %v2908_v58 }
  0xbe   : > { %2184 = vmatpush3.bf16.msk.msra.mxu0 %vm2783_vm4, %v2544_v14  ;;  %1968 = vmatprep.mubr.f32.mxu0 %v2967_v40 }
  0xbf   : > { %2256 = vmatpush3.bf16.msra.mxu1 %v2253_v57  ;;  %2186 = vmatprep.subr.msk.bf16.mxu0 %vm2794_vm7, %v2544_v14 }
  0xc0   : > { %2258 = vmatprep.subr.msk.bf16.mxu1 %vm2917_vm0, %v2544_v14 }
  0xc1   : > { %1969 = vmatmul.mubr.f32.gmra.mrb[2].mxu0 %v3002_v63 }
  0xc2   : > { %2078 = vmatmul.mubr.f32.vlgmr.msra.gmra.mrb[4].mxu1 %v3045_v43  ;;  %2188 = vmatpush3.bf16.msk.msra.mxu0 %vm2794_vm7, %v2544_v14 }
  0xc3   : > { %2260 = vmatpush3.bf16.msk.msra.mxu1 %vm2917_vm0, %v2544_v14  ;;  %2190 = vmatprep.subr.msk.bf16.mxu0 %vm2834_vm11, %v2544_v14 }
  0xc4   : > { %2262 = vmatprep.subr.msk.bf16.mxu1 %vm2996_vm6, %v2544_v14  ;;  %2080 = vmatprep.mubr.f32.mxu1 %v3074_v27 }
  0xc5   : > { %1987 = vmatprep.mubr.f32.mxu0 %v2873_v42 }
  0xc6   : > { %2192 = vmatpush3.bf16.msk.msra.mxu0 %vm2834_vm11, %v2544_v14  ;;  %2081 = vmatmul.mubr.f32.gmra.mrb[6].mxu1 %v3096_v9 }
  0xc7   : > { %2264 = vmatpush3.bf16.msk.msra.mxu1 %vm2996_vm6, %v2544_v14  ;;  %2194 = vmatprep.subr.msk.bf16.mxu0 %vm2879_vm13, %v2544_v14 }
  0xc8   : > { %2266 = vmatprep.subr.msk.bf16.mxu1 %vm3040_vm8, %v2544_v14  ;;  %2095 = vmatprep.mubr.f32.mxu1 %v3006_v7 }
  0xca   : > { %2196 = vmatpush3.bf16.msk.msra.mxu0 %vm2879_vm13, %v2544_v14 }
  0xcb   : > { %2268 = vmatpush3.bf16.msk.msra.mxu1 %vm3040_vm8, %v2544_v14 }
  0xcd   : > { %1988 = vmatmul.mubr.f32.vlgmr.msra.gmra.mrb[0].mxu0 %v2908_v58 }
  0xce   : > { %2096 = vmatmul.mubr.f32.vlgmr.msra.gmra.mrb[4].mxu1 %v3045_v43  ;;  %1990 = vmatprep.mubr.f32.mxu0 %v2967_v40 }
  0xcf   : > { %2098 = vmatprep.mubr.f32.mxu1 %v3074_v27 }
  0xd1   : > { %1991 = vmatmul.mubr.f32.gmra.mrb[2].mxu0 %v3002_v63 }
  0xd2   : > { %2099 = vmatmul.mubr.f32.gmra.mrb[6].mxu1 %v3096_v9 }
 0x156   : > { %v1879_v10 = vpop.f32.mrb[0].mxu1 }
 0x157   : > { %v387_v15 = vpop.f32.mrb[1].mxu1 }
 0x160   : > { %v1882_v26 = vpop.f32.mrb[2].mxu1 }
 0x161   : > { %v407_v42 = vpop.f32.mrb[3].mxu1 }
 0x1a0   : > { %v1989_v44 = vpop.f32.mrb[0].mxu0 }
 0x1a1   : > { %v2097_v59 = vpop.f32.mrb[4].mxu1  ;;  %v2269_v60 = vadd.f32 %v1989_v44, %v1879_v10  ;;  %v912_v14 = vpop.f32.mrb[1].mxu0 }
 0x1a2   : > { %v1533_v0 = vpop.f32.mrb[5].mxu1  ;;  %v2270_v58 = vadd.f32 %v912_v14, %v387_v15 }
 0x1a3   : > { %v1556_v8 = vmul.f32 %v2269_v60, %v2097_v59 }
 0x1a4   : > { %v1555_v19 = vmul.f32 %v2270_v58, %v1533_v0  ;;  %v1992_v22 = vpop.f32.mrb[2].mxu0 }
 0x1a5   : > { %v2100_v40 = vpop.f32.mrb[6].mxu1  ;;  %v2271_v49 = vadd.f32 %v1992_v22, %v1882_v26  ;;  %v924_v51 = vpop.f32.mrb[3].mxu0 }
 0x1a6   : > { %v1559_v52 = vadd.f32 %v1556_v8, %v1555_v19  ;;  %v1545_v11 = vpop.f32.mrb[7].mxu1  ;;  %v2272_v61 = vadd.f32 %v924_v51, %v407_v42 }
 0x1a7   : > { %v1558_v63 = vmul.f32 %v2271_v49, %v2100_v40 }
 0x1a8   : > { %v1557_v2 = vmul.f32 %v2272_v61, %v1545_v11 }
 0x1aa   : > { %v1560_v7 = vadd.f32 %v1559_v52, %v1557_v2 }
 0x1ac   : > { %v1561_v3 = vadd.f32 %v1560_v7, %v1558_v63 }
 0x1ae   : > { %v1562_v12 = vrot.slane %v1561_v3, 4 }
 0x1b0   : > { %v1563_v25 = vadd.f32 %v1562_v12, %v1561_v3 }
 0x1b2   : > { %v1564_v39 = vrot.slane %v1563_v25, 2 }
 0x1b4   : > { %v1565_v43 = vadd.f32 %v1564_v39, %v1563_v25 }
 0x1b6   : > { %v1566_v46 = vrot.slane %v1565_v43, 1 }
 0x1b8   : > { %v1567_v48 = vadd.f32 %v1566_v46, %v1565_v43 }
 0x1ba   : > { %1568 = vst [vmem:[%s248_s5] sm:$0x1] %v1567_v48 }
 0x1bb   : > { %2479 = shalt.err (!%p2476_p13)
}
 0x1bc   : > { %s2480_s27 = scalar_lea.hbm %s3282_s10, 16  ;;  %s2484_s21 = scalar_lea.hbm %s3330_s4, 32 }
 0x1bd   : > { %p2481_p6 = scmp.ne.s32.totalorder %s3282_s10, %s2480_s27  ;;  %p2485_p4 = scmp.lt.u32.totalorder %s3282_s10, %s3330_s4 }
 0x1be   : > { %p2486_p5 = scmp.lt.u32.totalorder %s2484_s21, %s2480_s27  ;;  %p2488_p11 = scmp.lt.u32.totalorder %s2480_s27, %s3282_s10 }
 0x1bf   : > { %p2482_p10 = pnand %p2481_p6, %p3378_p1 }
 0x1c0   : > { %p2487_p8 = por %p2486_p5, %p2485_p4 }
 0x1c1   : > { %p2483_p0 = pneg %p2482_p10 }
 0x1c2   : > { %p2489_p3 = por %p2488_p11, %p2487_p8 }
 0x1c4   : > { %p2490_p7 = pnand %p2489_p3, %p2483_p0 }
 0x1c6   : > { %2493 = shalt.err (!%p2490_p7)
}
 0x1c7   : > { %2319 = dma.vmem_to_hbm [thread:$0]  (%p3378_p1), %s3284_s7, 16, %s3282_s10, %s1570_s20  }
 0x1c8 PF: > { %s1594_s29 = sand.u32 1, %s2524_s15   ;;  %p3379_p9 = scmp.ne.s32.totalorder %s3345_s22, 0 }
 0x1c9   : > { %p3380_p12 = scmp.ge.s32.totalorder %s2536_s18, 2  ;;  %s1595_s30 = scalar_lea.sflag [#allocation4], %s1594_s29 }
 0x1cb   : > { %p2333_p2 = pnand %p3380_p12, %p3379_p9 }
 0x1cd   : > { %2519 = dma.done.wait (!%p2333_p2), %s1595_s30, 16  }
 0x1ce   : > { %2521 = vsyncadd (!%p2333_p2), %s1595_s30, 4294967280  ;;  %p18_p13 = scmp.ge.s32.totalorder %s2681_s9, 4   ;;  %s3381_s15 = smov %s2528_s16 }
 0x1cf   : > { %s3382_s16 = smov %s2532_s17  ;;  %s3383_s17 = smov %s2697_s14 }
 0x1d0   : > { %s3384_s18 = smov %s2681_s9  ;;  %20 = sbr.rel (!%p18_p13) target bundleno = 6 (0x6), region = 92 }
 0x1d7   :  { %1599 = vsyncpa [#allocation3], 1 }
 0x1d8   :  { %1601 = vsyncpa [#allocation3 + $0x1], 1 }
 0x1d9   :  { %1602 = vsyncpa [#allocation6], 1 }
 0x1da   :  { %1603 = vsyncpa [#allocation4], 1 }
 0x1db   :  { %1605 = vsyncpa [#allocation4 + $0x1], 1 }

</bundles_post_ra>
